<compile_context>
chip_gen: v5e
topology: v5e:2x2
jax: 0.10.0
libtpu: 0.0.40
codegen_flags: <defaults>
</compile_context>

<pallas_src>
import functools

import jax
import jax.numpy as jnp
from jax.experimental import pallas as pl
from jax.experimental.pallas import tpu as pltpu


def _time_embed_kernel(w_hbm_ref, o_hbm_ref, copy_sem, *, out_seq: int):
    # Single DMA: rows [0, out_seq) of W_pos (HBM) -> output (HBM).
    cp = pltpu.make_async_copy(
        w_hbm_ref.at[pl.ds(0, out_seq), :], o_hbm_ref, copy_sem)
    cp.start()
    cp.wait()


def time_embed(x: jax.Array, W_pos: jax.Array) -> jax.Array:
    """Pallas implementation of TimeEmbed.forward: W_pos[:x.shape[1], :]."""
    out_seq = x.shape[1]            # static under jit (mirrors torch x.shape[1])
    seq_len, d_model = W_pos.shape
    assert out_seq <= seq_len, "x sequence longer than positional table"

    dtype = W_pos.dtype
    itemsize = jnp.dtype(dtype).itemsize
    bytes_moved = 2 * out_seq * d_model * itemsize   # HBM read + HBM write

    kernel = functools.partial(_time_embed_kernel, out_seq=out_seq)

    return pl.pallas_call(
        kernel,
        out_shape=jax.ShapeDtypeStruct((out_seq, d_model), dtype),
        # No grid, no VMEM staging: operands remain in HBM and the kernel
        # moves the row window with one DMA (the DMA engine handles the copy;
        # TensorCore issue slots and VMEM are untouched on all generations).
        in_specs=[pl.BlockSpec(memory_space=pl.ANY)],
        out_specs=pl.BlockSpec(memory_space=pl.ANY),
        scratch_shapes=[pltpu.SemaphoreType.DMA(())],
        cost_estimate=pl.CostEstimate(
            flops=0, transcendentals=0, bytes_accessed=bytes_moved),
    )(W_pos)


if __name__ == "__main__":
    key = jax.random.PRNGKey(0)
    k_w, k_x = jax.random.split(key)

    # Small shapes consistent with the module.  x's seq (8) is shorter than
    # the table's seq_len (16) to exercise the row-window slice; d_model=128
    # keeps the output lane-dense.
    batch, table_seq_len, d_model, feat = 2, 16, 128, 16
    x_seq = 8

    # nn.Parameter(t.zeros(seq_len, d_model)) -> deterministic synthetic init
    # (zeros would make the check trivial, so use a deterministic random fill).
    W_pos = jax.random.normal(k_w, (table_seq_len, d_model), dtype=jnp.float32)

    # x: (batch, seq, feat) — only x.shape[1] matters for the forward pass.
    x = jax.random.normal(k_x, (batch, x_seq, feat), dtype=jnp.float32)

    out = jax.block_until_ready(time_embed(x, W_pos))

    # Reference (pure JAX, mirrors torch: W_pos[arange(x.shape[1])]).
    ref = W_pos[jnp.arange(x.shape[1])]

    assert out.shape == (x.shape[1], d_model), out.shape
    assert out.dtype == W_pos.dtype, out.dtype
    assert jnp.allclose(out, ref), "mismatch vs reference"

    print("KERNEL_OK")
</pallas_src>

<mosaic_0001>
module attributes {stable_mosaic.version = 11 : i64} {
  func.func @_time_embed_kernel(%arg0: memref<16x128xf32, #tpu.memory_space<any>>, %arg1: memref<8x128xf32, #tpu.memory_space<any>>, %arg2: memref<!tpu.dma_semaphore, #tpu.memory_space<semaphore_mem>>) attributes {dimension_semantics = [], scalar_prefetch = 0 : i64, scratch_operands = 1 : i64, tpu.core_type = #tpu.core_type<tc>} {
    %c0_i32 = arith.constant 0 : i32
    %c0_i32_0 = arith.constant 0 : i32
    %0 = tpu.memref_slice %arg0[%c0_i32, %c0_i32_0] : memref<16x128xf32, #tpu.memory_space<any>> -> memref<8x128xf32, #tpu.memory_space<any>>
    tpu.enqueue_dma source(%0 : memref<8x128xf32, #tpu.memory_space<any>>) target(%arg1 : memref<8x128xf32, #tpu.memory_space<any>>) target_semaphore(%arg2 : memref<!tpu.dma_semaphore, #tpu.memory_space<semaphore_mem>>)
    %c0_i32_1 = arith.constant 0 : i32
    %c0_i32_2 = arith.constant 0 : i32
    %1 = tpu.memref_slice %arg0[%c0_i32_1, %c0_i32_2] : memref<16x128xf32, #tpu.memory_space<any>> -> memref<8x128xf32, #tpu.memory_space<any>>
    tpu.wait_dma2 semaphore(%arg2 : memref<!tpu.dma_semaphore, #tpu.memory_space<semaphore_mem>>) src(%1 : memref<8x128xf32, #tpu.memory_space<any>>) dst(%arg1 : memref<8x128xf32, #tpu.memory_space<any>>)
    return
  }
}

</mosaic_0001>

<bundles_post_ra>
// kernel: tpu_custom_call.1
= control target key start
LH: loop header
LB: loop body
LE: loop exit
PB: predicated region body
PF: predicated region fallthrough
CT: control target
= control target key end

     0   :  { %s32_s12 = smov [#allocation2]   ;;  %s33_s13 = smov [#allocation3]   ;;  %s51_s0 = inlined_call_operand.hbm [shape: f32[16,128], index: 0, kind: input, shape index: {}]   ;;  %s52_s1 = inlined_call_operand.hbm [shape: f32[8,128], index: 1, kind: output, shape index: {}]  }
   0x1   :  { %s10_s8 = sshll.u32 %s51_s0, 4  ;;  %s12_s11 = sshll.u32 %s52_s1, 4  ;;  %s11_s8 = int_to_ptr.hbm [resolvable:$true] %s10_s8  ;;  %s13_s11 = int_to_ptr.hbm [resolvable:$true] %s12_s11 }
   0x2   :  { %s34_s14 = smov 0  }
   0x3   :  { %16 = dma.general %s11_s8, 128, %s13_s11, %s32_s12, %s33_s13, [#allocation4], %s34_s14, 0  }
   0x4   :  { %30 = dma.done.wait [#allocation2], 128 }
   0x5   :  { %31 = vsyncadd [#allocation2], 4294967168 }
   0x6   :  { %20 = vsyncmov [#allocation2] }
   0x9   :  { %s21_s15 = vpop.sfrf %20 }
   0xa   :  { %p26_p0 = scmp.ne.s32.totalorder %s21_s15, 0 }
   0xc   :  { %25 = shalt.err (%p26_p0)  }

</bundles_post_ra>
